<compile_context>
chip_gen: v5e
topology: v5e:2x2
jax: 0.10.0
libtpu: 0.0.40
codegen_flags: <defaults>
</compile_context>

<pallas_src>
import numpy as np
import jax
import jax.numpy as jnp
from jax.experimental import pallas as pl
from jax.experimental.pallas import tpu as pltpu


LANE = 128  # TPU lane width; minor-dim padding target


def _round_up(v, m):
    return (v + m - 1) // m * m


# ----------------------------------------------------------------------------
# Host-side glue: separable RoIAlign interpolation weights (torchvision
# semantics, aligned=False, sampling_ratio=-1), combined per ROI into a single
# kron'd weight matrix so the kernel does one MXU matmul per ROI.
# ----------------------------------------------------------------------------
def _fill_axis(wm, start, bin_sz, g, length):
    pooled = wm.shape[0]
    for p in range(pooled):
        for i in range(g):
            y = start + p * bin_sz + (i + 0.5) * bin_sz / g
            if y < -1.0 or y > length:
                continue  # sample point fully outside -> contributes 0
            if y <= 0.0:
                y = 0.0
            lo = int(np.floor(y))
            if lo >= length - 1:
                lo = length - 1
                hi = length - 1
                ly = 0.0
            else:
                hi = lo + 1
                ly = y - lo
            wm[p, lo] += (1.0 - ly) / g
            wm[p, hi] += ly / g


def roi_align_weights(rois, spatial_scale, pooled, height, width):
    """rois: (N, 4) numpy (x1, y1, x2, y2). Returns Wy (N,P,H), Wx (N,P,W)."""
    n = rois.shape[0]
    wy = np.zeros((n, pooled, height), np.float32)
    wx = np.zeros((n, pooled, width), np.float32)
    for r in range(n):
        x1, y1, x2, y2 = (rois[r] * spatial_scale).astype(np.float64)
        roi_w = max(x2 - x1, 1.0)
        roi_h = max(y2 - y1, 1.0)
        bin_h = roi_h / pooled
        bin_w = roi_w / pooled
        gy = max(int(np.ceil(roi_h / pooled)), 1)  # sampling_ratio = -1 (adaptive)
        gx = max(int(np.ceil(roi_w / pooled)), 1)
        _fill_axis(wy[r], y1, bin_h, gy, height)
        _fill_axis(wx[r], x1, bin_w, gx, width)
    return wy, wx


def roi_align_kron_weights(rois, spatial_scale, pooled, height, width, pp_pad,
                           n_pad):
    """Returns (n_pad, H*W, pp_pad) f32 so that pooled_flat = feat(C,H*W) @ W.

    Rows [n_rois, n_pad) are zero (padding ROIs -> zero pooled features)."""
    wy, wx = roi_align_weights(rois, spatial_scale, pooled, height, width)
    n = rois.shape[0]
    # w[r, py*P + px, h*W + w] = wy[r, py, h] * wx[r, px, w]
    w = np.einsum("rph,rqw->rpqhw", wy, wx).reshape(n, pooled * pooled,
                                                    height * width)
    wt = np.zeros((n_pad, height * width, pp_pad), np.float32)
    wt[:n, :, : pooled * pooled] = np.transpose(w, (0, 2, 1))
    return wt


# ----------------------------------------------------------------------------
# Kernel 1: RoIAlign (single matmul per ROI / channel block) + QG2 modulation.
# ----------------------------------------------------------------------------
def roialign_qg_kernel(bidx_ref, x_ref, wt_ref, temp_ref, out_ref):
    # bidx_ref: SMEM scalar prefetch (only used by the index_map)
    # x_ref:    (1, CB, H*W)     bf16 feature-map channel block of this ROI's image
    # wt_ref:   (1, H*W, PPpad)  bf16 per-ROI kron'd bilinear + bin-average weights
    # temp_ref: (CB, PPpad)      f32 QG2 modulation (flattened, zero-padded)
    # out_ref:  (1, CB, PPpad)   bf16 lane-dense pooled+modulated output
    del bidx_ref
    pooled = jnp.dot(x_ref[0], wt_ref[0],
                     preferred_element_type=jnp.float32)        # (CB, PPpad) f32
    # TODO(synk): QG2.forward is not defined in the source; implemented as
    # query-guided elementwise modulation pooled * temp.
    out_ref[0] = (pooled * temp_ref[...]).astype(out_ref.dtype)


def _pick_cb(n_chan, hw, bytes_per_elem=2, budget=16 * 1024 * 1024):
    """Largest channel block that keeps the double-buffered feature tile small."""
    cb = n_chan
    while cb % 2 == 0 and cb >= 32 and 2 * cb * hw * bytes_per_elem > budget:
        cb //= 2
    assert n_chan % cb == 0
    return cb


def roi_align_qg(x2, bidx, wt, temp_pad, *, vmem_limit_bytes=32 * 1024 * 1024):
    n_pad_rois = wt.shape[0]
    _, n_chan, hw = x2.shape
    pp_pad = wt.shape[2]
    cb = _pick_cb(n_chan, hw)
    n_cb = n_chan // cb
    # Grid: ROI axis outer, channel-block axis inner.  The per-ROI kron weight is
    # invariant across the inner axis (DMA'd once per ROI); with cb == n_chan
    # (common case) the feature-map block is also invariant across consecutive
    # same-image ROIs (sorted host-side), so its DMA is elided too.
    return pl.pallas_call(
        roialign_qg_kernel,
        out_shape=jax.ShapeDtypeStruct((n_pad_rois, n_chan, pp_pad),
                                       jnp.bfloat16),
        grid_spec=pltpu.PrefetchScalarGridSpec(
            num_scalar_prefetch=1,
            grid=(n_pad_rois, n_cb),
            in_specs=[
                pl.BlockSpec((1, cb, hw), lambda r, c, bidx: (bidx[r], c, 0)),
                pl.BlockSpec((1, hw, pp_pad), lambda r, c, bidx: (r, 0, 0)),
                pl.BlockSpec((cb, pp_pad), lambda r, c, bidx: (c, 0)),
            ],
            out_specs=pl.BlockSpec((1, cb, pp_pad),
                                   lambda r, c, bidx: (r, c, 0)),
        ),
        compiler_params=pltpu.CompilerParams(
            dimension_semantics=("parallel", "parallel"),
            vmem_limit_bytes=vmem_limit_bytes),
    )(bidx, x2, wt, temp_pad)


# ----------------------------------------------------------------------------
# Kernel 2: fused classifier stand-in + (cls_loc ++ score) heads.
#   grid = (rows/tm, K/tk); f32 accumulator; bias + ReLU + head matmul in the
#   finalize branch; bf16 MXU operands with f32 accumulation.
# ----------------------------------------------------------------------------
def head_kernel(pool_ref, wc_ref, bc_ref, wh_ref, bh_ref, out_ref, acc_ref):
    k = pl.program_id(1)

    @pl.when(k == 0)
    def _():
        acc_ref[...] = jnp.zeros_like(acc_ref)

    acc_ref[...] += jnp.dot(pool_ref[...], wc_ref[...],
                            preferred_element_type=jnp.float32)

    @pl.when(k == pl.num_programs(1) - 1)
    def _():
        # TODO(synk): `classifier` is an external ResNet tail in the original
        # module; stand-in is flatten -> Linear(C*P*P, 2048) -> ReLU.
        fc7 = jnp.maximum(acc_ref[...] + bc_ref[...], 0.0)        # f32 bias + ReLU
        out_ref[...] = (jnp.dot(fc7.astype(jnp.bfloat16), wh_ref[...],
                                preferred_element_type=jnp.float32)
                        + bh_ref[...])


def _pick_tk(k_dim, target=512):
    tk = min(target, k_dim)
    while k_dim % tk:
        tk -= LANE
    return tk


def fused_heads(pool2, wc, bc, wh, bh, *, tm,
                vmem_limit_bytes=32 * 1024 * 1024):
    n_pad, k_dim = pool2.shape
    d = wc.shape[1]
    hout = wh.shape[1]
    tk = _pick_tk(k_dim)
    assert n_pad % tm == 0 and k_dim % tk == 0
    return pl.pallas_call(
        head_kernel,
        out_shape=jax.ShapeDtypeStruct((n_pad, hout), jnp.float32),
        grid_spec=pltpu.PrefetchScalarGridSpec(
            num_scalar_prefetch=0,
            grid=(n_pad // tm, k_dim // tk),
            in_specs=[
                pl.BlockSpec((tm, tk), lambda i, k: (i, k)),
                pl.BlockSpec((tk, d), lambda i, k: (k, 0)),
                pl.BlockSpec((1, d), lambda i, k: (0, 0)),
                pl.BlockSpec((d, hout), lambda i, k: (0, 0)),
                pl.BlockSpec((1, hout), lambda i, k: (0, 0)),
            ],
            out_specs=pl.BlockSpec((tm, hout), lambda i, k: (i, 0)),
            scratch_shapes=[pltpu.VMEM((tm, d), jnp.float32)],
        ),
        compiler_params=pltpu.CompilerParams(
            dimension_semantics=("parallel", "arbitrary"),
            vmem_limit_bytes=vmem_limit_bytes),
    )(pool2, wc, bc, wh, bh)


# ----------------------------------------------------------------------------
# Full forward, mirroring RCNN.forward(temp, x, rois, roi_indices).
# ----------------------------------------------------------------------------
def rcnn_forward(temp, x, rois_np, roi_indices_np, params, roi_size,
                 spatial_scale, n_class):
    batch, n_chan, height, width = x.shape
    pooled = roi_size
    pp_pad = _round_up(pooled * pooled, LANE)

    rois_np = np.asarray(rois_np, np.float32)
    roi_indices_np = np.asarray(roi_indices_np, np.int32)
    n_rois = rois_np.shape[0]

    # Pad ROI rows to the MXU/bf16-friendly row tile (multiple of 16, cap 128);
    # padded ROIs get zero kron weights so their pooled features are exactly 0.
    n_pad = _round_up(n_rois, 16) if n_rois <= 128 else _round_up(n_rois, 128)
    tm = min(128, n_pad)

    # Sort ROIs by batch index so consecutive grid steps hit the same feature-map
    # block (Pallas elides the repeated HBM->VMEM DMA); unsort outputs at the end.
    order = np.argsort(roi_indices_np, kind="stable")
    inv_order = np.argsort(order)
    rois_sorted = rois_np[order]
    bidx_sorted = roi_indices_np[order]
    bidx_padded = np.full((n_pad,), bidx_sorted[-1] if n_rois else 0, np.int32)
    bidx_padded[:n_rois] = bidx_sorted

    wt = jnp.asarray(
        roi_align_kron_weights(rois_sorted, spatial_scale, pooled,
                               height, width, pp_pad, n_pad),
        jnp.bfloat16)
    bidx = jnp.asarray(bidx_padded, jnp.int32)

    # Lane-dense, contiguous reshapes (no relayout); bf16 MXU operands.
    x2 = x.astype(jnp.bfloat16).reshape(batch, n_chan, height * width)
    temp_pad = jnp.zeros((n_chan, pp_pad), jnp.float32)
    temp_pad = temp_pad.at[:, : pooled * pooled].set(
        temp.reshape(n_chan, pooled * pooled).astype(jnp.float32))

    pool = roi_align_qg(x2, bidx, wt, temp_pad)            # (n_pad, C, pp_pad) bf16
    pool2 = pool.reshape(n_pad, n_chan * pp_pad)           # contiguous collapse

    out = fused_heads(pool2, params["wc"], params["bc"],
                      params["wh"], params["bh"], tm=tm)
    out = out[:n_rois]
    loc_sorted = out[:, : n_class * 4]
    score_sorted = out[:, n_class * 4: n_class * 4 + n_class]
    inv = jnp.asarray(inv_order, jnp.int32)
    return loc_sorted[inv], score_sorted[inv]


if __name__ == "__main__":
    # Small synthetic configuration.
    B, C, H, W = 2, 4, 16, 16
    P = 4                       # roi_size
    spatial_scale = 0.5
    n_class = 3
    n_rois = 8
    D = 2048                    # classifier output features (as in the module)
    PP_PAD = _round_up(P * P, LANE)
    K_true = C * P * P
    K_pad = C * PP_PAD
    HOUT = _round_up(n_class * 5, LANE)  # fused (cls_loc ++ score), 128-lane padded

    key = jax.random.PRNGKey(0)
    kx, kt, kc, kl, ks = jax.random.split(key, 5)

    x = jax.random.normal(kx, (B, C, H, W), jnp.float32)
    temp = jax.random.normal(kt, (C, P, P), jnp.float32)

    # ROIs in image coordinates (image is H/scale x W/scale = 32 x 32), (x1,y1,x2,y2).
    rng = np.random.RandomState(0)
    xy1 = rng.uniform(0.0, 20.0, size=(n_rois, 2)).astype(np.float32)
    wh_box = rng.uniform(4.0, 12.0, size=(n_rois, 2)).astype(np.float32)
    rois_np = np.concatenate([xy1, xy1 + wh_box], axis=1)          # (n_rois, 4)
    roi_indices_np = rng.randint(0, B, size=(n_rois,)).astype(np.int32)

    # Classifier stand-in weights, scattered into the lane-padded pooled layout
    # (padded positions of pool are exactly zero, so their weights never matter).
    wc_true = 0.01 * jax.random.normal(kc, (K_true, D), jnp.float32)
    wc_pad = jnp.zeros((C, PP_PAD, D), jnp.float32)
    wc_pad = wc_pad.at[:, : P * P, :].set(wc_true.reshape(C, P * P, D))
    wc_pad = wc_pad.reshape(K_pad, D)

    # cls_loc / score weights (normal_init std 0.001 / 0.01, zero bias), fused and
    # padded to a single lane-dense 128-wide head.
    wl = 0.001 * jax.random.normal(kl, (D, n_class * 4), jnp.float32)
    ws = 0.01 * jax.random.normal(ks, (D, n_class), jnp.float32)
    wh_fused = jnp.zeros((D, HOUT), jnp.float32)
    wh_fused = wh_fused.at[:, : n_class * 4].set(wl)
    wh_fused = wh_fused.at[:, n_class * 4: n_class * 4 + n_class].set(ws)

    params = {
        "wc": wc_pad.astype(jnp.bfloat16),   # bf16 MXU operands, f32 accumulation
        "bc": jnp.zeros((1, D), jnp.float32),
        "wh": wh_fused.astype(jnp.bfloat16),
        "bh": jnp.zeros((1, HOUT), jnp.float32),
    }

    cls_locs, scores = rcnn_forward(temp, x, rois_np, roi_indices_np, params,
                                    P, spatial_scale, n_class)
    jax.block_until_ready((cls_locs, scores))
    assert cls_locs.shape == (n_rois, n_class * 4)
    assert scores.shape == (n_rois, n_class)
    print("KERNEL_OK")
</pallas_src>

<mosaic_0001>
module attributes {stable_mosaic.version = 11 : i64} {
  func.func @roialign_qg_kernel(%arg0: i32, %arg1: i32, %arg2: memref<16xi32, #tpu.memory_space<smem>>, %arg3: memref<1x4x256xbf16, #tpu.memory_space<vmem>>, %arg4: memref<1x256x128xbf16, #tpu.memory_space<vmem>>, %arg5: memref<4x128xf32, #tpu.memory_space<vmem>>, %arg6: memref<1x4x128xbf16, #tpu.memory_space<vmem>>) attributes {dimension_semantics = [#tpu.dimension_semantics<parallel>, #tpu.dimension_semantics<parallel>], iteration_bounds = array<i64: 16, 1>, scalar_prefetch = 1 : i64, scratch_operands = 0 : i64, tpu.core_type = #tpu.core_type<tc>, window_params = [{transform_indices = @transform_0, window_bounds = array<i64: 1, 4, 256>}, {transform_indices = @transform_1, window_bounds = array<i64: 1, 256, 128>}, {transform_indices = @transform_2, window_bounds = array<i64: 4, 128>}, {transform_indices = @transform_3, window_bounds = array<i64: 1, 4, 128>}]} {
    %c0 = arith.constant 0 : index
    %c0_0 = arith.constant 0 : index
    %c0_1 = arith.constant 0 : index
    %0 = vector.load %arg3[%c0, %c0_0, %c0_1] : memref<1x4x256xbf16, #tpu.memory_space<vmem>>, vector<1x4x256xbf16>
    %1 = vector.shape_cast %0 : vector<1x4x256xbf16> to vector<4x256xbf16>
    %c0_2 = arith.constant 0 : index
    %c0_3 = arith.constant 0 : index
    %c0_4 = arith.constant 0 : index
    %2 = vector.load %arg4[%c0_2, %c0_3, %c0_4] : memref<1x256x128xbf16, #tpu.memory_space<vmem>>, vector<1x256x128xbf16>
    %3 = vector.shape_cast %2 : vector<1x256x128xbf16> to vector<256x128xbf16>
    %cst = arith.constant dense<0.000000e+00> : vector<4x128xf32>
    %4 = tpu.matmul %1, %3, %cst {dimension_numbers = #tpu.dot_dimension_numbers<[1], [0], [0], [1], [0, 0, 1, 1], [], []>} : vector<4x256xbf16>, vector<256x128xbf16>, vector<4x128xf32> -> vector<4x128xf32>
    %c0_5 = arith.constant 0 : index
    %c0_6 = arith.constant 0 : index
    %5 = vector.load %arg5[%c0_5, %c0_6] : memref<4x128xf32, #tpu.memory_space<vmem>>, vector<4x128xf32>
    %6 = arith.mulf %4, %5 : vector<4x128xf32>
    %7 = arith.truncf %6 : vector<4x128xf32> to vector<4x128xbf16>
    %c0_7 = arith.constant 0 : index
    %c0_8 = arith.constant 0 : index
    %c0_9 = arith.constant 0 : index
    %8 = vector.load %arg6[%c0_7, %c0_8, %c0_9] : memref<1x4x128xbf16, #tpu.memory_space<vmem>>, vector<1x4x128xbf16>
    %9 = vector.shape_cast %8 : vector<1x4x128xbf16> to vector<4x128xbf16>
    %10 = vector.shape_cast %7 : vector<4x128xbf16> to vector<1x4x128xbf16>
    tpu.vector_store %arg6[%c0_7, %c0_8, %c0_9], %10 {strides = array<i32>} : memref<1x4x128xbf16, #tpu.memory_space<vmem>>, vector<1x4x128xbf16>,
    return
  }
  func.func @transform_0(%arg0: i32, %arg1: i32, %arg2: memref<16xi32, #tpu.memory_space<smem>>) -> (i32, i32, i32) {
    %0 = arith.index_cast %arg0 : i32 to index
    %1 = memref.load %arg2[%0] : memref<16xi32, #tpu.memory_space<smem>>
    %c0_i32 = arith.constant 0 : i32
    %c0_i32_0 = arith.constant 0 : i32
    return %1, %arg1, %c0_i32 : i32, i32, i32
  }
  func.func @transform_1(%arg0: i32, %arg1: i32, %arg2: memref<16xi32, #tpu.memory_space<smem>>) -> (i32, i32, i32) {
    %c0_i32 = arith.constant 0 : i32
    %c0_i32_0 = arith.constant 0 : i32
    %c0_i32_1 = arith.constant 0 : i32
    return %arg0, %c0_i32, %c0_i32_0 : i32, i32, i32
  }
  func.func @transform_2(%arg0: i32, %arg1: i32, %arg2: memref<16xi32, #tpu.memory_space<smem>>) -> (i32, i32) {
    %c0_i32 = arith.constant 0 : i32
    %c0_i32_0 = arith.constant 0 : i32
    return %arg1, %c0_i32 : i32, i32
  }
  func.func @transform_3(%arg0: i32, %arg1: i32, %arg2: memref<16xi32, #tpu.memory_space<smem>>) -> (i32, i32, i32) {
    %c0_i32 = arith.constant 0 : i32
    %c0_i32_0 = arith.constant 0 : i32
    return %arg0, %arg1, %c0_i32 : i32, i32, i32
  }
}

</mosaic_0001>

<bundles_post_ra>
// kernel: tpu_custom_call.1
= control target key start
LH: loop header
LB: loop body
LE: loop exit
PB: predicated region body
PF: predicated region fallthrough
CT: control target
= control target key end

     0   :  { %s1012_s18 = smov [#allocation3]   ;;  %s1298_s0 = inlined_call_operand.hbm [shape: s32[16], index: 0, kind: input, shape index: {}]   ;;  %s1299_s1 = inlined_call_operand.hbm [shape: bf16[2,4,256], index: 1, kind: input, shape index: {}]   ;;  %s1300_s2 = inlined_call_operand.hbm [shape: bf16[16,256,128], index: 2, kind: input, shape index: {}]   ;;  %s1301_s3 = inlined_call_operand.hbm [shape: f32[4,128], index: 3, kind: input, shape index: {}]   ;;  %s1302_s4 = inlined_call_operand.hbm [shape: bf16[16,4,128], index: 4, kind: output, shape index: {}]  }
   0x1   :  { %1311 = sst [smem:[#allocation26_spill]] %s1301_s3  ;;  %s10_s17 = sshll.u32 %s1298_s0, 4  ;;  %s11_s17 = int_to_ptr.hbm [resolvable:$true] %s10_s17 }
   0x2   :  { %1312 = sst [smem:[#allocation27_spill]] %s1302_s4 }
   0x3   :  { %13 = dma.hbm_to_smem %s11_s17, 16, %s1012_s18, [#allocation2] }
   0x4   :  { %958 = dma.done.wait [#allocation2], 16 }
   0x5   :  { %959 = vsyncadd [#allocation2], 4294967280 }
   0x6   :  { %16 = sfence }
   0x7   :  { %17 = vsyncpa [#allocation5], 0 }
   0x8   :  { %19 = vsyncpa [#allocation5 + $0x1], 0 }
   0x9   :  { %20 = vsyncpa [#allocation8], 0 }
   0xa   :  { %22 = vsyncpa [#allocation8 + $0x1], 0 }
   0xb   :  { %23 = vsyncpa [#allocation6], 0 }
   0xc   :  { %25 = vsyncpa [#allocation6 + $0x1], 0  ;;  %s1044_s19 = smov 0   ;;  %s1046_s20 = smov 0  }
   0xd   :  { %s1048_s21 = smov 0   ;;  %s1050_s22 = smov 0  }
   0xe   :  { %s1052_s0 = smov 0   ;;  %s1054_s23 = smov 0  }
   0xf   :  { %s1056_s24 = smov 0   ;;  %s1058_s25 = smov 0  }
  0x10   :  { %s1060_s26 = smov 0  }
  0x11 LB: > { %1313 = sst [smem:[#allocation18_spill]] %s978_s19  ;;  %s1088_s27 = sadd.s32 4294967295, %s1010_s26   ;;  %s1010_s26 = sphi %s1060_s26, %s31_s26   ;;  %s1006_s25 = sphi %s1058_s25, %s1350_s25   ;;  %s1002_s24 = sphi %s1056_s24, %s1349_s24   ;;  %s998_s23 = sphi %s1054_s23, %s1342_s23   ;;  %s994_s0 = sphi %s1052_s0, %s1348_s0   ;;  %s990_s22 = sphi %s1050_s22, %s1347_s22   ;;  %s986_s21 = sphi %s1048_s21, %s1346_s21   ;;  %s982_s20 = sphi %s1046_s20, %s1345_s20   ;;  %s978_s19 = sphi %s1044_s19, %s1344_s19  }
  0x12   : > { %1314 = sst [smem:[#allocation19_spill]] %s998_s23  ;;  %s582_s28 = sadd.s32 4294967294, %s1010_s26  }
  0x13   : > { %1315 = sst [smem:[#allocation20_spill]] %s1002_s24  ;;  %p67_p0 = scmp.ne.s32.totalorder %s994_s0, %s990_s22 }
  0x14   : > { %p1310_p1 = scmp.eq.s32.totalorder %s1088_s27, 0  ;;  %s80_s29 = sadd.s32 1, %s986_s21 }
  0x15   : > { %p87_p2 = scmp.ne.s32.totalorder %s986_s21, %s982_s20  ;;  %p93_p4 = scmp.ne.s32.totalorder %s982_s20, %s978_s19 }
  0x16   : > { %p1098_p3 = por %p1310_p1, %p67_p0  ;;  %p145_p5 = scmp.eq.s32.totalorder %s1088_s27, 15 }
  0x17   : > { %p151_p6 = scmp.eq.s32.totalorder %s582_s28, 15  ;;  %p1107_p7 = por %p93_p4, %p1310_p1 }
  0x18   : > { %p583_p8 = scmp.ge.s32.totalorder %s1010_s26, 1  ;;  %p1115_p9 = por %p145_p5, %p87_p2 }
  0x19   : > { %p1119_p10 = por %p151_p6, %p93_p4  ;;  %p158_p11 = scmp.lt.s32.totalorder %s1010_s26, 17 }
  0x1a   : > { %s1318_s6 = scalar_select %p1115_p9, 1, 0 }
  0x1b   : > { %s1320_s7 = scalar_select %p1119_p10, 1, 0 }
  0x1c   : > { %1319 = sst [smem:[#allocation21_spill]] %s1318_s6  ;;  %p1127_p12 = pnand %p583_p8, %p158_p11 }
  0x1d   : > { %1321 = sst [smem:[#allocation22_spill]] %s1320_s7  ;;  %s1013_s12 = smov [#allocation9]  }
  0x1e   : > { %s1322_s3 = sld [smem:[#allocation26_spill]]  ;;  %s174_s13 = sshll.u32 %s1013_s12, 4  ;;  %s175_s13 = int_to_ptr.vmem [resolvable:$true] %s174_s13 }
  0x1f   : > { %p695_p13 = pneg %p1127_p12  ;;  %s43_s14 = sadd.s32 1, %s1006_s25 }
  0x20   : > { %p45_p4 = scmp.ge.s32.totalorder %s43_s14, 16  ;;  %s47_s15 = sld [smem:[#allocation3 + %s1006_s25]] }
  0x21   : > { %p696_p0 = pnand %p695_p13, %p1310_p1  ;;  %s54_s16 = sadd.s32 1, %s998_s23 }
  0x22   : > { %s1352_s14 = smov (%p45_p4, %s43_s14), 0  ;;  %p61_p5 = scmp.ne.s32.totalorder %s998_s23, %s994_s0 }
  0x23   : > { %1324 = sst [smem:[#allocation23_spill]] %s1352_s14  ;;  %p62_p6 = scmp.eq.s32.totalorder %s1010_s26, 0 }
  0x24   : > { %s172_s10 = sshll.u32 %s1322_s3, 4  ;;  %s48_s17 = sld [smem:[#allocation3 + %s1352_s14]]  ;;  %s173_s10 = int_to_ptr.hbm [resolvable:$true] %s172_s10 }
  0x25   : > { %698 = dma.hbm_to_vmem [thread:$0]  (!%p696_p0), %s173_s10, 64, %s175_s13, [#allocation8]  }
  0x26   : > { %s77_s18 = ssub.s32 %s1006_s25, %s1352_s14  ;;  %p713_p11 = scmp.lt.s32.totalorder %s1010_s26, 16 }
  0x27   : > { %p78_p8 = scmp.eq.s32.totalorder %s77_s18, 0  ;;  %p63_p13 = por %p62_p6, %p61_p5 }
  0x28   : > { %p1150_p0 = por %p87_p2, %p62_p6  ;;  %s185_s8 = sand.u32 1, %s998_s23  }
  0x29   : > { %s1157_s28 = scalar_select %p78_p8, %s986_s21, %s80_s29  }
  0x2a   : > { %p1162_p4 = pnand %p713_p11, %p63_p13  ;;  %s49_s10 = ssub.s32 %s47_s15, %s48_s17 }
  0x2b   : > { %1326 = sst [smem:[#allocation24_spill]] %s1157_s28  ;;  %p52_p5 = scmp.eq.s32.totalorder %s49_s10, 0 }
  0x2c   : > { %s586_s12 = sshll.u32 %s185_s8, 2  ;;  %p1180_p2 = pnand %p713_p11, %p1150_p0 }
  0x2d   : > { %s1167_s13 = scalar_select %p52_p5, %s998_s23, %s54_s16  }
  0x2e   : > { %s685_s18 = scalar_select %p63_p13, [#allocation3], [#allocation11] }
  0x2f   : > { %1328 = sst [smem:[#allocation25_spill]] %s1167_s13  ;;  %s189_s29 = scalar_lea.vmem [#allocation4], %s586_s12 }
  0x30   : > { %s686_s3 = scalar_select %p63_p13, %s1006_s25, 0 }
  0x31   : > { %s1354_s18 = smov (!%p713_p11, %s685_s18), [#allocation12]  ;;  %s1174_s14 = sshll.u32 %s189_s29, 4  ;;  %s202_s14 = int_to_ptr.vmem [resolvable:$true] %s1174_s14 }
  0x32   : > { %s1356_s3 = smov (!%p713_p11, %s686_s3), 0  ;;  %s210_s17 = sand.u32 1, %s986_s21  }
  0x33   : > { %s190_s15 = sld [smem:[%s1354_s18 + %s1356_s3]]  ;;  %s589_s10 = sshll.u32 %s210_s17, 7 }
  0x34   : > { %s666_s13 = sshll.u32 %s1006_s25, 7  ;;  %s212_s19 = scalar_lea.vmem [#allocation7], %s589_s10 }
  0x35   : > { %s217_s12 = scalar_lea.hbm %s1300_s2, %s666_s13  ;;  %s1191_s22 = sshll.u32 %s212_s19, 4  ;;  %s221_s22 = int_to_ptr.vmem [resolvable:$true] %s1191_s22 }
  0x36   : > { %s218_s29 = sshll.u32 %s217_s12, 4  ;;  %s186_s17 = scalar_lea.sflag [#allocation5], %s185_s8  ;;  %s219_s29 = int_to_ptr.hbm [resolvable:$true] %s218_s29 }
  0x37   : > { %p838_p8 = pneg %p1162_p4  ;;  %s841_s13 = scalar_lea.hbm %s1299_s1, 8 }
  0x39   : > { %s665_s6 = sshll.u32 %s190_s15, 2 }
  0x3a   : > { %s197_s3 = scalar_lea.hbm %s1299_s1, %s665_s6 }
  0x3b   : > { %s199_s18 = sshll.u32 %s197_s3, 4  ;;  %s200_s18 = int_to_ptr.hbm [resolvable:$true] %s199_s18 }
  0x3c   : > { %s834_s16 = sshra.s32 %s200_s18, 4  ;;  %s835_s16 = int_to_ptr.hbm [resolvable:$true] %s834_s16 }
  0x3d   : > { %s836_s23 = scalar_lea.hbm %s835_s16, 4  ;;  %p842_p0 = scmp.lt.s32.totalorder %s835_s16, %s1299_s1 }
  0x3e   : > { %p837_p6 = scmp.ne.s32.totalorder %s835_s16, %s836_s23  ;;  %p843_p5 = scmp.lt.s32.totalorder %s841_s13, %s836_s23 }
  0x40   : > { %p839_p11 = pnand %p838_p8, %p837_p6  ;;  %p844_p1 = por %p843_p5, %p842_p0 }
  0x42   : > { %p840_p13 = pneg %p839_p11 }
  0x44   : > { %p845_p10 = pnand %p844_p1, %p840_p13 }
  0x46   : > { %848 = shalt.err (!%p845_p10)
}
  0x47   : > { %704 = dma.hbm_to_vmem [thread:$0]  (!%p1162_p4), %s200_s18, 64, %s202_s14, %s186_s17  }
  0x48   : > { %s1330_s4 = sand.u32 1, %s1010_s26   ;;  %s1014_s6 = smov 64  }
  0x49   : > { %s209_s24 = scalar_lea.sflag [#allocation8], %s1330_s4  ;;  %s1015_s8 = smov 4  }
  0x4a   : > { %707 = dma.hbm_to_vmem [thread:$0]  (!%p1180_p2), %s219_s29, 2048, %s221_s22, %s209_s24, %s1014_s6, %s1014_s6, %s1015_s8  }
  0x4b   : > { %232 = sbr.rel (%p1127_p12) target bundleno = 257 (0x101), region = 32  ;;  %s234_s16 = sand.u32 (!%p1127_p12), 1, %s994_s0  }
  0x4c   : > { %s593_s12 = sshll.u32 (!%p1127_p12), %s234_s16, 2  ;;  %s235_s3 = scalar_lea.sflag (!%p1127_p12), [#allocation5], %s234_s16 }
  0x4d   : > { %s238_s9 = scalar_lea.vmem (!%p1127_p12), [#allocation4], %s593_s12 }
  0x50   : > { %961 = dma.done.wait (%p1098_p3), %s235_s3, 64  }
  0x51   : > { %963 = vsyncadd (%p1098_p3), %s235_s3, 4294967232  ;;  %s244_s14 = sand.u32 1, %s1088_s27   ;;  %s1222_s28 = sand.u32 1, %s982_s20  }
  0x52   : > { %s594_s11 = sshll.u32 %s1222_s28, 7  ;;  %s245_s29 = scalar_lea.sflag [#allocation8], %s244_s14 }
  0x53   : > { %s1225_s22 = scalar_lea.vmem [#allocation7], %s594_s11 }
  0x54   : > { %965 = dma.done.wait (%p1107_p7), %s245_s29, 2048  }
  0x55   : > { %967 = vsyncadd (%p1107_p7), %s245_s29, 4294965248  ;;  %p1331_p1 = scmp.eq.s32.totalorder %s1088_s27, 0 }
  0x57   : > { %969 = dma.done.wait (%p1331_p1), [#allocation8], 64   ;;  %p1332_p3 = pmov %p1331_p1 }
  0x58   : > { %v674_v0 = vld [vmem:[%s1225_s22 + $0x38] sm:$0xff]  ;;  %v673_v2 = vld [vmem:[%s1225_s22 + $0x30] sm:$0xff]  ;;  %v672_v5 = vld [vmem:[%s1225_s22 + $0x28] sm:$0xff]  ;;  %s1333_s27 = sld [smem:[#allocation20_spill]]  ;;  %s596_s30 = sshll.u32 %s1222_s28, 1 }
  0x59   : > { %971 = vsyncadd (%p1332_p3), [#allocation8], 4294967232  ;;  %v682_v1 = vld [vmem:[%s1225_s22 + $0x78] sm:$0xff]  ;;  %418 = vmatpush.bf16.msra.mxu0 %v674_v0  ;;  %v681_v3 = vld [vmem:[%s1225_s22 + $0x70] sm:$0xff]  ;;  %s1334_s23 = sld [smem:[#allocation27_spill]]  ;;  %s281_s15 = scalar_lea.vmem [#allocation10], %s596_s30 }
  0x5a   : > { %431 = vmatpush.bf16.msra.mxu1 %v682_v1  ;;  %v283_v4 = vld [vmem:[%s238_s9] sm:$0xf]  ;;  %v680_v6 = vld [vmem:[%s1225_s22 + $0x68] sm:$0xff]  ;;  %v671_v7 = vld [vmem:[%s1225_s22 + $0x20] sm:$0xff]  ;;  %s462_s10 = sshll.u32 %s281_s15, 4  ;;  %s449_s24 = scalar_lea.sflag [#allocation6], %s1222_s28  ;;  %s463_s10 = int_to_ptr.vmem [resolvable:$true] %s462_s10 }
  0x5b   : > { %317 = vst [vmem:[#allocation1] ss:$4 sm:$0xff] %v283_v4  ;;  %v679_v8 = vld [vmem:[%s1225_s22 + $0x60] sm:$0xff]  ;;  %v670_v9 = vld [vmem:[%s1225_s22 + $0x18] sm:$0xff]  ;;  %v669_v11 = vld [vmem:[%s1225_s22 + $0x10] sm:$0xff] }
  0x5c   : > { %v678_v10 = vld [vmem:[%s1225_s22 + $0x58] sm:$0xff]  ;;  %v677_v12 = vld [vmem:[%s1225_s22 + $0x50] sm:$0xff]  ;;  %v668_v13 = vld [vmem:[%s1225_s22 + $0x8] sm:$0xff] }
  0x5d   : > { %419 = vmatpush.bf16.msra.mxu0 %v673_v2  ;;  %v676_v14 = vld [vmem:[%s1225_s22 + $0x48] sm:$0xff]  ;;  %v667_v15 = vld [vmem:[%s1225_s22] sm:$0xff] }
  0x5e   : > { %432 = vmatpush.bf16.msra.mxu1 %v681_v3  ;;  %v675_v16 = vld [vmem:[%s1225_s22 + $0x40] sm:$0xff]  ;;  %s662_s5 = sshll.u32 %s1333_s27, 1 }
  0x5f   : > { %s1335_s7 = smov %s1334_s23  ;;  %s460_s19 = scalar_lea.hbm %s1334_s23, %s662_s5  ;;  %v444_v21 = vld [vmem:[#allocation9] sm:$0xf] }
  0x60   : > { %s464_s4 = sshll.u32 %s460_s19, 4  ;;  %s914_s3 = scalar_lea.hbm %s1335_s7, 32  ;;  %s465_s4 = int_to_ptr.hbm [resolvable:$true] %s464_s4 }
  0x61   : > { %420 = vmatpush.bf16.msra.mxu0 %v672_v5  ;;  %s908_s6 = sshra.s32 %s465_s4, 4  ;;  %s909_s6 = int_to_ptr.hbm [resolvable:$true] %s908_s6 }
  0x62   : > { %433 = vmatpush.bf16.msra.mxu1 %v680_v6  ;;  %v318_v17 = vld.sshfl [vmem:[#allocation1] sm:$0xff pattern:$0x73625140]  ;;  %v319_v18 = vld.sshfl [vmem:[#allocation1 + $0x8] sm:$0xff pattern:$0x73625140]  ;;  %p915_p4 = scmp.lt.s32.totalorder %s909_s6, %s1335_s7 }
  0x63   : > { %s910_s8 = scalar_lea.hbm %s909_s6, 2 }
  0x64   : > { %p911_p7 = scmp.ne.s32.totalorder %s909_s6, %s910_s8  ;;  %p916_p2 = scmp.lt.s32.totalorder %s914_s3, %s910_s8 }
  0x65   : > { %421 = vmatpush.bf16.msra.mxu0 %v671_v7 }
  0x66   : > { %434 = vmatpush.bf16.msra.mxu1 %v679_v8  ;;  %p912_p10 = pnand %p911_p7, %p1115_p9  ;;  %p917_p6 = por %p916_p2, %p915_p4 }
  0x68   : > { %p913_p12 = pneg %p912_p10 }
  0x69   : > { %422 = vmatpush.bf16.msra.mxu0 %v670_v9 }
  0x6a   : > { %435 = vmatpush.bf16.msra.mxu1 %v678_v10  ;;  %p918_p8 = pnand %p917_p6, %p913_p12 }
  0x6d   : > { %423 = vmatpush.bf16.msra.mxu0 %v669_v11 }
  0x6e   : > { %436 = vmatpush.bf16.msra.mxu1 %v677_v12 }
  0x71   : > { %424 = vmatpush.bf16.msra.mxu0 %v668_v13 }
  0x72   : > { %437 = vmatpush.bf16.msra.mxu1 %v676_v14 }
  0x75   : > { %425 = vmatpush.bf16.msra.mxu0 %v667_v15 }
  0x76   : > { %438 = vmatpush.bf16.msra.mxu1 %v675_v16 }
  0x78   : > { %426 = vmatmul.bf16.vlgmr.msra.gmra.mxu0 %v318_v17 }
  0x79   : > { %439 = vmatmul.bf16.vlgmr.msra.gmra.mxu1 %v319_v18 }
  0xf5   : > { %v427_v19 = vpop.f32.mrf.mxu0 }
  0xf6   : > { %v440_v20 = vpop.f32.mrf.mxu1 }
  0xf7   : > { %v441_v22 = vadd.f32 %v440_v20, %v427_v19 }
  0xf9   : > { %v445_v23 = vmul.f32 %v444_v21, %v441_v22 }
  0xfb   : > { %v446_v24 = vpack.c.bf16 %v445_v23, %v445_v23 }
  0xfd   : > { %447 = vst [vmem:[%s281_s15] sm:$0x3] %v446_v24  ;;  %v429_v25 = vpop.f32.mrf.mxu0 }
  0xfe   : > { %v442_v26 = vpop.f32.mrf.mxu1 }
  0xff   : > { %921 = shalt.err (!%p918_p8)
}
 0x100   : > { %693 = dma.vmem_to_hbm [thread:$0]  (%p1115_p9), %s463_s10, 32, %s465_s4, %s449_s24  }
 0x101 PF: > { %s1337_s28 = sld [smem:[#allocation18_spill]]  ;;  %p715_p11 = scmp.ge.s32.totalorder %s1010_s26, 2 }
 0x102   : > { %s1338_s11 = sld [smem:[#allocation22_spill]] }
 0x107   : > { %s476_s29 = sand.u32 1, %s1337_s28  }
 0x108   : > { %p1339_p13 = scmp.ne.s32.totalorder %s1338_s11, 0  ;;  %s477_s22 = scalar_lea.sflag [#allocation6], %s476_s29 }
 0x10a   : > { %p709_p0 = pnand %p715_p11, %p1339_p13 }
 0x10c   : > { %p710_p5 = pneg %p709_p0 }
 0x10e   : > { %973 = dma.done.wait (%p710_p5), %s477_s22, 32  }
 0x10f   : > { %975 = vsyncadd (%p710_p5), %s477_s22, 4294967264  ;;  %s31_s26 = sadd.s32 1, %s1010_s26   ;;  %s1340_s27 = sld [smem:[#allocation24_spill]] }
 0x110   : > { %p28_p1 = scmp.ge.s32.totalorder %s31_s26, 18   ;;  %s1341_s30 = sld [smem:[#allocation19_spill]] }
 0x111   : > { %s1342_s23 = sld [smem:[#allocation25_spill]]  ;;  %s1344_s19 = smov %s982_s20 }
 0x112   : > { %s1343_s5 = sld [smem:[#allocation23_spill]]  ;;  %s1345_s20 = smov %s986_s21 }
 0x113   : > { %s1347_s22 = smov %s994_s0  ;;  %s1349_s24 = smov %s1006_s25 }
 0x114   :  { %30 = sbr.rel (!%p28_p1) target bundleno = 17 (0x11), region = 95 }
 0x115   : > { %s1346_s21 = smov %s1340_s27 }
 0x116   : > { %s1348_s0 = smov %s1341_s30 }
 0x118   : > { %s1350_s25 = smov %s1343_s5 }
 0x119   :  { %483 = vsyncpa [#allocation5], 1 }
 0x11a   :  { %485 = vsyncpa [#allocation5 + $0x1], 1 }
 0x11b   :  { %486 = vsyncpa [#allocation8], 1 }
 0x11c   :  { %488 = vsyncpa [#allocation8 + $0x1], 1 }
 0x11d   :  { %489 = vsyncpa [#allocation6], 1 }
 0x11e   :  { %491 = vsyncpa [#allocation6 + $0x1], 1 }

</bundles_post_ra>
